<compile_context>
chip_gen: v5e
topology: v5e:2x2
jax: 0.10.0
libtpu: 0.0.40
codegen_flags: <defaults>
</compile_context>

<pallas_src>
import functools

import jax
import jax.numpy as jnp
from jax.experimental import pallas as pl
from jax.experimental.pallas import tpu as pltpu

BN_EPS = 1e-5


# --------------------------------------------------------------------------
# Kernel
# --------------------------------------------------------------------------
def mlp_head_kernel(src_ref, tgt_ref, w1_ref, w2_ref, w3_ref, wh_ref, b_ref,
                    out_ref, smax_ref, tmax_ref, *, n_total):
    """src_ref/tgt_ref: (TB, E, TN) streamed f32 tiles (native NCW layout).
    out_ref: (1, TB, 8).  smax/tmax: (TB, E) f32 running-max scratch."""
    n = pl.program_id(1)
    n_last = pl.num_programs(1) - 1
    tn = src_ref.shape[-1]
    E = smax_ref.shape[-1]

    # ---- init running-max accumulators at the start of each batch block ----
    @pl.when(n == 0)
    def _():
        smax_ref[...] = jnp.full(smax_ref.shape, -jnp.inf, dtype=smax_ref.dtype)
        tmax_ref[...] = jnp.full(tmax_ref.shape, -jnp.inf, dtype=tmax_ref.dtype)

    # ---- running max over this points chunk (lane-axis reduce) ----
    s = src_ref[...]                                   # (TB, E, TN) f32
    t = tgt_ref[...]
    if n_total % tn != 0:
        # Static: only emitted when the last N block is partial.  Mask the
        # out-of-bounds tail with -inf (identity for max).
        idx = jax.lax.broadcasted_iota(jnp.int32, s.shape, 2)
        valid = idx < (n_total - n * tn)
        s = jnp.where(valid, s, -jnp.inf)
        t = jnp.where(valid, t, -jnp.inf)
    smax_ref[...] = jnp.maximum(smax_ref[...], jnp.max(s, axis=-1))
    tmax_ref[...] = jnp.maximum(tmax_ref[...], jnp.max(t, axis=-1))

    # ---- after the last N chunk: fused Linear(+BN)+ReLU MLP + rot/trans head ----
    @pl.when(n == n_last)
    def _():
        d1 = w1_ref.shape[1]
        d2 = w2_ref.shape[1]
        d3 = w3_ref.shape[1]
        dh = wh_ref.shape[1]                           # 8 (quat 4 | trans 3 | pad 1)

        xs = smax_ref[...]                             # (TB, E)
        xt = tmax_ref[...]                             # (TB, E)

        # Linear(cat(src_max, tgt_max)) == xs @ W[:E] + xt @ W[E:]  (no concat)
        h = (jnp.dot(xs, w1_ref[:E, :], preferred_element_type=jnp.float32)
             + jnp.dot(xt, w1_ref[E:, :], preferred_element_type=jnp.float32)
             + b_ref[0:1, :d1])
        h = jnp.maximum(h, 0.0)

        h = jnp.dot(h, w2_ref[...], preferred_element_type=jnp.float32) + b_ref[1:2, :d2]
        h = jnp.maximum(h, 0.0)

        h = jnp.dot(h, w3_ref[...], preferred_element_type=jnp.float32) + b_ref[2:3, :d3]
        h = jnp.maximum(h, 0.0)

        # Fused heads: cols 0:4 raw quaternion, cols 4:7 translation, col 7 pad.
        out_ref[0] = (jnp.dot(h, wh_ref[...], preferred_element_type=jnp.float32)
                      + b_ref[3:4, :dh])


# --------------------------------------------------------------------------
# Wrapper-side parameter preparation (BN folding + head fusion + bias packing)
# --------------------------------------------------------------------------
def _fold_bn(w, b, gamma, beta, rm, rv, eps=BN_EPS):
    scale = gamma * jax.lax.rsqrt(rv + eps)            # (1, dout)
    return w * scale, (b - rm) * scale + beta


def prepare_params(params):
    (w1, b1, g1, be1, rm1, rv1,
     w2, b2, g2, be2, rm2, rv2,
     w3, b3, g3, be3, rm3, rv3,
     wr, br, wt, bt) = params
    w1, b1 = _fold_bn(w1, b1, g1, be1, rm1, rv1)
    w2, b2 = _fold_bn(w2, b2, g2, be2, rm2, rv2)
    w3, b3 = _fold_bn(w3, b3, g3, be3, rm3, rv3)
    dlast = wr.shape[0]
    wh = jnp.concatenate([wr, wt, jnp.zeros((dlast, 1), jnp.float32)], axis=1)  # (dlast, 8)
    bh = jnp.concatenate([br, bt, jnp.zeros((1, 1), jnp.float32)], axis=1)      # (1, 8)

    # Row-packed biases: row 0 = b1 (width d1), row 1 = b2, row 2 = b3, row 3 = head.
    d1 = w1.shape[1]

    def row(b):
        return jnp.pad(b, ((0, 0), (0, d1 - b.shape[1])))

    b_all = jnp.concatenate([row(b1), row(b2), row(b3), row(bh)], axis=0)        # (4, d1)
    return w1, w2, w3, wh, b_all


def quat2mat(quat):
    """DCP convention: quat columns are (x, y, z, w)."""
    qx, qy, qz, qw = quat[:, 0], quat[:, 1], quat[:, 2], quat[:, 3]
    w2, x2, y2, z2 = qw * qw, qx * qx, qy * qy, qz * qz
    wx, wy, wz = qw * qx, qw * qy, qw * qz
    xy, xz, yz = qx * qy, qx * qz, qy * qz
    rot = jnp.stack(
        [w2 + x2 - y2 - z2, 2 * xy - 2 * wz, 2 * wy + 2 * xz,
         2 * wz + 2 * xy, w2 - x2 + y2 - z2, 2 * yz - 2 * wx,
         2 * xz - 2 * wy, 2 * wx + 2 * yz, w2 - x2 - y2 + z2], axis=1)
    return rot.reshape(-1, 3, 3)


# --------------------------------------------------------------------------
# Generation-aware tiling
# --------------------------------------------------------------------------
def _rup(x, m):
    return (x + m - 1) // m * m


def _vmem_capacity_bytes():
    try:
        info = pltpu.get_tpu_info()
        for attr in ("vmem_capacity_bytes", "vmem_size_bytes", "vmem_bytes"):
            v = getattr(info, attr, None)
            if v:
                return int(v)
    except Exception:
        pass
    return 64 << 20   # conservative default (v7x per-TC physical VMEM)


def _pick_n_tile(vmem_limit, resident_bytes, b_tile, E, N):
    """Largest lane-aligned N chunk that fits 2 inputs x double-buffer in budget."""
    scratch_bytes = 2 * b_tile * _rup(E, 128) * 4
    margin = 4 << 20
    stream_budget = max(vmem_limit - 2 * resident_bytes - scratch_bytes - margin, 2 << 20)
    per_point = 2 * 2 * b_tile * _rup(E, 8) * 4        # 2 inputs x 2 buffers, f32
    n_tile = stream_budget // per_point
    if n_tile >= N:
        return int(N)                                  # whole N in one block (full dim)
    n_tile = max(128, (n_tile // 128) * 128)           # lane-aligned chunks
    return int(min(n_tile, N))


# --------------------------------------------------------------------------
# Forward
# --------------------------------------------------------------------------
def mlp_head_forward(src, tgt, params, *, b_tile=None, n_tile=None):
    """src, tgt: (B, emb_dims, N) float32 (native PyTorch NCW layout).
    Returns (R (B,3,3), t (B,3))."""
    B, E, N = src.shape
    src = src.astype(jnp.float32)
    tgt = tgt.astype(jnp.float32)

    w1, w2, w3, wh, b_all = prepare_params(params)
    resident = [w1, w2, w3, wh, b_all]
    resident_bytes = sum(int(a.size) * a.dtype.itemsize for a in resident)

    # ---- tile sizes ----
    if b_tile is None:
        # >=2 batch blocks whenever B>=2 so the "parallel" axis can shard
        # across v7x's two TensorCores.
        b_tile = max(1, min(8, -(-B // 2)))
    gb = -(-B // b_tile)

    cap = _vmem_capacity_bytes()
    vmem_limit = min(3 * cap // 4, 96 << 20)
    if n_tile is None:
        n_tile = _pick_n_tile(vmem_limit, resident_bytes, b_tile, E, N)
    gn = -(-N // n_tile)

    stream_spec = pl.BlockSpec((b_tile, E, n_tile), lambda b, n: (b, 0, n))

    def resident_spec(a):   # constant index_map -> fetched once, stays in VMEM
        return pl.BlockSpec(a.shape, lambda b, n: (0, 0))

    kernel = functools.partial(mlp_head_kernel, n_total=N)

    head = pl.pallas_call(
        kernel,
        out_shape=jax.ShapeDtypeStruct((gb, b_tile, 8), jnp.float32),
        grid_spec=pltpu.PrefetchScalarGridSpec(
            num_scalar_prefetch=0,
            grid=(gb, gn),
            in_specs=[stream_spec, stream_spec] + [resident_spec(a) for a in resident],
            out_specs=pl.BlockSpec((1, b_tile, 8), lambda b, n: (b, 0, 0)),
            scratch_shapes=[pltpu.VMEM((b_tile, E), jnp.float32),
                            pltpu.VMEM((b_tile, E), jnp.float32)]),
        compiler_params=pltpu.CompilerParams(
            dimension_semantics=("parallel", "arbitrary"),
            vmem_limit_bytes=int(vmem_limit)),
    )(src, tgt, *resident)

    head = head.reshape(gb * b_tile, 8)[:B]            # drop ragged-batch rows
    r = head[:, :4]
    t = head[:, 4:7]
    # eps-clamped L2 normalization (guards against a degenerate zero quaternion)
    r = r * jax.lax.rsqrt(jnp.maximum(jnp.sum(r * r, axis=-1, keepdims=True), 1e-12))
    return quat2mat(r), t


# --------------------------------------------------------------------------
# Reference (pure JAX, mirrors the PyTorch module in eval mode)
# --------------------------------------------------------------------------
def mlp_head_reference(src, tgt, params):
    (w1, b1, g1, be1, rm1, rv1,
     w2, b2, g2, be2, rm2, rv2,
     w3, b3, g3, be3, rm3, rv3,
     wr, br, wt, bt) = params
    x = jnp.concatenate([jnp.max(src, axis=-1), jnp.max(tgt, axis=-1)], axis=-1)

    def block(h, w, b, g, be, rm, rv):
        h = h @ w + b
        h = (h - rm) * jax.lax.rsqrt(rv + BN_EPS) * g + be
        return jnp.maximum(h, 0.0)

    h = block(x, w1, b1, g1, be1, rm1, rv1)
    h = block(h, w2, b2, g2, be2, rm2, rv2)
    h = block(h, w3, b3, g3, be3, rm3, rv3)
    r = h @ wr + br
    r = r / jnp.sqrt(jnp.sum(r * r, axis=-1, keepdims=True))
    t = h @ wt + bt
    return quat2mat(r), t


# --------------------------------------------------------------------------
# Parameter construction (same raw layout as the PyTorch module)
# --------------------------------------------------------------------------
def init_params(key, emb_dims):
    layer_dims = [(emb_dims * 2, emb_dims // 2),
                  (emb_dims // 2, emb_dims // 4),
                  (emb_dims // 4, emb_dims // 8)]
    keys = iter(jax.random.split(key, 3 * 6 + 4))
    params = []
    for din, dout in layer_dims:
        w = jax.random.normal(next(keys), (din, dout), jnp.float32) / jnp.sqrt(din)
        b = 0.01 * jax.random.normal(next(keys), (1, dout), jnp.float32)
        gamma = 1.0 + 0.1 * jax.random.normal(next(keys), (1, dout), jnp.float32)
        beta = 0.1 * jax.random.normal(next(keys), (1, dout), jnp.float32)
        run_mean = 0.1 * jax.random.normal(next(keys), (1, dout), jnp.float32)
        run_var = 1.0 + 0.1 * jnp.abs(jax.random.normal(next(keys), (1, dout), jnp.float32))
        params += [w, b, gamma, beta, run_mean, run_var]
    dlast = emb_dims // 8
    wr = jax.random.normal(next(keys), (dlast, 4), jnp.float32) / jnp.sqrt(dlast)
    br = 0.01 * jax.random.normal(next(keys), (1, 4), jnp.float32)
    wt = jax.random.normal(next(keys), (dlast, 3), jnp.float32) / jnp.sqrt(dlast)
    bt = 0.01 * jax.random.normal(next(keys), (1, 3), jnp.float32)
    params += [wr, br, wt, bt]
    return params


if __name__ == "__main__":
    B, emb_dims, N = 2, 32, 8
    key = jax.random.PRNGKey(0)
    k_src, k_tgt, k_par = jax.random.split(key, 3)
    src_embedding = jax.random.normal(k_src, (B, emb_dims, N), jnp.float32)
    tgt_embedding = jax.random.normal(k_tgt, (B, emb_dims, N), jnp.float32)
    params = init_params(k_par, emb_dims)

    R, t = mlp_head_forward(src_embedding, tgt_embedding, params)
    jax.block_until_ready((R, t))

    assert R.shape == (B, 3, 3) and t.shape == (B, 3)
    assert bool(jnp.all(jnp.isfinite(R))) and bool(jnp.all(jnp.isfinite(t)))

    # Cross-check against the pure-JAX reference (f32 end-to-end now).
    R_ref, t_ref = mlp_head_reference(src_embedding, tgt_embedding, params)
    assert float(jnp.max(jnp.abs(R - R_ref))) < 5e-2
    assert float(jnp.max(jnp.abs(t - t_ref))) < 5e-2

    print("KERNEL_OK")
</pallas_src>

<mosaic_0001>
module attributes {stable_mosaic.version = 11 : i64} {
  func.func @mlp_head_kernel(%arg0: i32, %arg1: i32, %arg2: memref<1x32x8xf32, #tpu.memory_space<vmem>>, %arg3: memref<1x32x8xf32, #tpu.memory_space<vmem>>, %arg4: memref<64x16xf32, #tpu.memory_space<vmem>>, %arg5: memref<16x8xf32, #tpu.memory_space<vmem>>, %arg6: memref<8x4xf32, #tpu.memory_space<vmem>>, %arg7: memref<4x8xf32, #tpu.memory_space<vmem>>, %arg8: memref<4x16xf32, #tpu.memory_space<vmem>>, %arg9: memref<1x1x8xf32, #tpu.memory_space<vmem>>, %arg10: memref<1x32xf32, #tpu.memory_space<vmem>>, %arg11: memref<1x32xf32, #tpu.memory_space<vmem>>) attributes {dimension_semantics = [#tpu.dimension_semantics<parallel>, #tpu.dimension_semantics<arbitrary>], iteration_bounds = array<i64: 2, 1>, scalar_prefetch = 0 : i64, scratch_operands = 2 : i64, tpu.core_type = #tpu.core_type<tc>, window_params = [{transform_indices = @transform_0, window_bounds = array<i64: 1, 32, 8>}, {transform_indices = @transform_1, window_bounds = array<i64: 1, 32, 8>}, {pipeline_mode = #tpu.pipeline_mode<synchronous>, transform_indices = @transform_2, window_bounds = array<i64: 64, 16>}, {pipeline_mode = #tpu.pipeline_mode<synchronous>, transform_indices = @transform_3, window_bounds = array<i64: 16, 8>}, {pipeline_mode = #tpu.pipeline_mode<synchronous>, transform_indices = @transform_4, window_bounds = array<i64: 8, 4>}, {pipeline_mode = #tpu.pipeline_mode<synchronous>, transform_indices = @transform_5, window_bounds = array<i64: 4, 8>}, {pipeline_mode = #tpu.pipeline_mode<synchronous>, transform_indices = @transform_6, window_bounds = array<i64: 4, 16>}, {transform_indices = @transform_7, window_bounds = array<i64: 1, 1, 8>}]} {
    %c0_i32 = arith.constant 0 : i32
    %0 = arith.cmpi eq, %arg1, %c0_i32 : i32
    %1 = arith.extui %0 : i1 to i32
    %c0_i32_0 = arith.constant 0 : i32
    %2 = arith.cmpi ne, %1, %c0_i32_0 : i32
    scf.if %2 {
      %cst_17 = arith.constant 0xFF800000 : f32
      %16 = vector.broadcast %cst_17 : f32 to vector<1x32xf32>
      %c0_18 = arith.constant 0 : index
      %c0_19 = arith.constant 0 : index
      %17 = vector.load %arg10[%c0_18, %c0_19] : memref<1x32xf32, #tpu.memory_space<vmem>>, vector<1x32xf32>
      tpu.vector_store %arg10[%c0_18, %c0_19], %16 {strides = array<i32>} : memref<1x32xf32, #tpu.memory_space<vmem>>, vector<1x32xf32>,
      %cst_20 = arith.constant 0xFF800000 : f32
      %18 = vector.broadcast %cst_20 : f32 to vector<1x32xf32>
      %c0_21 = arith.constant 0 : index
      %c0_22 = arith.constant 0 : index
      %19 = vector.load %arg11[%c0_21, %c0_22] : memref<1x32xf32, #tpu.memory_space<vmem>>, vector<1x32xf32>
      tpu.vector_store %arg11[%c0_21, %c0_22], %18 {strides = array<i32>} : memref<1x32xf32, #tpu.memory_space<vmem>>, vector<1x32xf32>,
    } else {
    }
    %c0 = arith.constant 0 : index
    %c0_1 = arith.constant 0 : index
    %c0_2 = arith.constant 0 : index
    %3 = vector.load %arg2[%c0, %c0_1, %c0_2] : memref<1x32x8xf32, #tpu.memory_space<vmem>>, vector<1x32x8xf32>
    %c0_3 = arith.constant 0 : index
    %c0_4 = arith.constant 0 : index
    %c0_5 = arith.constant 0 : index
    %4 = vector.load %arg3[%c0_3, %c0_4, %c0_5] : memref<1x32x8xf32, #tpu.memory_space<vmem>>, vector<1x32x8xf32>
    %c0_6 = arith.constant 0 : index
    %c0_7 = arith.constant 0 : index
    %5 = vector.load %arg10[%c0_6, %c0_7] : memref<1x32xf32, #tpu.memory_space<vmem>>, vector<1x32xf32>
    %cst = arith.constant dense<0xFF800000> : vector<1x32xf32>
    %6 = vector.multi_reduction <maximumf>, %3, %cst [2] : vector<1x32x8xf32> to vector<1x32xf32>
    %7 = arith.maximumf %5, %6 : vector<1x32xf32>
    %c0_8 = arith.constant 0 : index
    %c0_9 = arith.constant 0 : index
    %8 = vector.load %arg10[%c0_8, %c0_9] : memref<1x32xf32, #tpu.memory_space<vmem>>, vector<1x32xf32>
    tpu.vector_store %arg10[%c0_8, %c0_9], %7 {strides = array<i32>} : memref<1x32xf32, #tpu.memory_space<vmem>>, vector<1x32xf32>,
    %c0_10 = arith.constant 0 : index
    %c0_11 = arith.constant 0 : index
    %9 = vector.load %arg11[%c0_10, %c0_11] : memref<1x32xf32, #tpu.memory_space<vmem>>, vector<1x32xf32>
    %cst_12 = arith.constant dense<0xFF800000> : vector<1x32xf32>
    %10 = vector.multi_reduction <maximumf>, %4, %cst_12 [2] : vector<1x32x8xf32> to vector<1x32xf32>
    %11 = arith.maximumf %9, %10 : vector<1x32xf32>
    %c0_13 = arith.constant 0 : index
    %c0_14 = arith.constant 0 : index
    %12 = vector.load %arg11[%c0_13, %c0_14] : memref<1x32xf32, #tpu.memory_space<vmem>>, vector<1x32xf32>
    tpu.vector_store %arg11[%c0_13, %c0_14], %11 {strides = array<i32>} : memref<1x32xf32, #tpu.memory_space<vmem>>, vector<1x32xf32>,
    %c0_i32_15 = arith.constant 0 : i32
    %13 = arith.cmpi eq, %arg1, %c0_i32_15 : i32
    %14 = arith.extui %13 : i1 to i32
    %c0_i32_16 = arith.constant 0 : i32
    %15 = arith.cmpi ne, %14, %c0_i32_16 : i32
    scf.if %15 {
      %c0_17 = arith.constant 0 : index
      %c0_18 = arith.constant 0 : index
      %16 = vector.load %arg10[%c0_17, %c0_18] : memref<1x32xf32, #tpu.memory_space<vmem>>, vector<1x32xf32>
      %c0_19 = arith.constant 0 : index
      %c0_20 = arith.constant 0 : index
      %17 = vector.load %arg11[%c0_19, %c0_20] : memref<1x32xf32, #tpu.memory_space<vmem>>, vector<1x32xf32>
      %c0_21 = arith.constant 0 : index
      %c0_22 = arith.constant 0 : index
      %18 = vector.load %arg4[%c0_21, %c0_22] : memref<64x16xf32, #tpu.memory_space<vmem>>, vector<32x16xf32>
      %cst_23 = arith.constant dense<0.000000e+00> : vector<1x16xf32>
      %19 = tpu.matmul %16, %18, %cst_23 {dimension_numbers = #tpu.dot_dimension_numbers<[1], [0], [0], [1], [0, 0, 1, 1], [], []>} : vector<1x32xf32>, vector<32x16xf32>, vector<1x16xf32> -> vector<1x16xf32>
      %c32 = arith.constant 32 : index
      %c0_24 = arith.constant 0 : index
      %20 = vector.load %arg4[%c32, %c0_24] : memref<64x16xf32, #tpu.memory_space<vmem>>, vector<32x16xf32>
      %cst_25 = arith.constant dense<0.000000e+00> : vector<1x16xf32>
      %21 = tpu.matmul %17, %20, %cst_25 {dimension_numbers = #tpu.dot_dimension_numbers<[1], [0], [0], [1], [0, 0, 1, 1], [], []>} : vector<1x32xf32>, vector<32x16xf32>, vector<1x16xf32> -> vector<1x16xf32>
      %22 = arith.addf %19, %21 : vector<1x16xf32>
      %c0_26 = arith.constant 0 : index
      %c0_27 = arith.constant 0 : index
      %23 = vector.load %arg8[%c0_26, %c0_27] : memref<4x16xf32, #tpu.memory_space<vmem>>, vector<1x16xf32>
      %24 = arith.addf %22, %23 : vector<1x16xf32>
      %cst_28 = arith.constant 0.000000e+00 : f32
      %25 = vector.broadcast %cst_28 : f32 to vector<1x16xf32>
      %26 = arith.maximumf %24, %25 : vector<1x16xf32>
      %c0_29 = arith.constant 0 : index
      %c0_30 = arith.constant 0 : index
      %27 = vector.load %arg5[%c0_29, %c0_30] : memref<16x8xf32, #tpu.memory_space<vmem>>, vector<16x8xf32>
      %cst_31 = arith.constant dense<0.000000e+00> : vector<1x8xf32>
      %28 = tpu.matmul %26, %27, %cst_31 {dimension_numbers = #tpu.dot_dimension_numbers<[1], [0], [0], [1], [0, 0, 1, 1], [], []>} : vector<1x16xf32>, vector<16x8xf32>, vector<1x8xf32> -> vector<1x8xf32>
      %c1 = arith.constant 1 : index
      %c0_32 = arith.constant 0 : index
      %29 = vector.load %arg8[%c1, %c0_32] : memref<4x16xf32, #tpu.memory_space<vmem>>, vector<1x8xf32>
      %30 = arith.addf %28, %29 : vector<1x8xf32>
      %cst_33 = arith.constant 0.000000e+00 : f32
      %31 = vector.broadcast %cst_33 : f32 to vector<1x8xf32>
      %32 = arith.maximumf %30, %31 : vector<1x8xf32>
      %c0_34 = arith.constant 0 : index
      %c0_35 = arith.constant 0 : index
      %33 = vector.load %arg6[%c0_34, %c0_35] : memref<8x4xf32, #tpu.memory_space<vmem>>, vector<8x4xf32>
      %cst_36 = arith.constant dense<0.000000e+00> : vector<1x4xf32>
      %34 = tpu.matmul %32, %33, %cst_36 {dimension_numbers = #tpu.dot_dimension_numbers<[1], [0], [0], [1], [0, 0, 1, 1], [], []>} : vector<1x8xf32>, vector<8x4xf32>, vector<1x4xf32> -> vector<1x4xf32>
      %c2 = arith.constant 2 : index
      %c0_37 = arith.constant 0 : index
      %35 = vector.load %arg8[%c2, %c0_37] : memref<4x16xf32, #tpu.memory_space<vmem>>, vector<1x4xf32>
      %36 = arith.addf %34, %35 : vector<1x4xf32>
      %cst_38 = arith.constant 0.000000e+00 : f32
      %37 = vector.broadcast %cst_38 : f32 to vector<1x4xf32>
      %38 = arith.maximumf %36, %37 : vector<1x4xf32>
      %c0_39 = arith.constant 0 : index
      %c0_40 = arith.constant 0 : index
      %39 = vector.load %arg7[%c0_39, %c0_40] : memref<4x8xf32, #tpu.memory_space<vmem>>, vector<4x8xf32>
      %cst_41 = arith.constant dense<0.000000e+00> : vector<1x8xf32>
      %40 = tpu.matmul %38, %39, %cst_41 {dimension_numbers = #tpu.dot_dimension_numbers<[1], [0], [0], [1], [0, 0, 1, 1], [], []>} : vector<1x4xf32>, vector<4x8xf32>, vector<1x8xf32> -> vector<1x8xf32>
      %c3 = arith.constant 3 : index
      %c0_42 = arith.constant 0 : index
      %41 = vector.load %arg8[%c3, %c0_42] : memref<4x16xf32, #tpu.memory_space<vmem>>, vector<1x8xf32>
      %42 = arith.addf %40, %41 : vector<1x8xf32>
      %c0_43 = arith.constant 0 : index
      %c0_44 = arith.constant 0 : index
      %c0_45 = arith.constant 0 : index
      %43 = vector.load %arg9[%c0_43, %c0_44, %c0_45] : memref<1x1x8xf32, #tpu.memory_space<vmem>>, vector<1x1x8xf32>
      %44 = vector.shape_cast %43 : vector<1x1x8xf32> to vector<1x8xf32>
      %45 = vector.shape_cast %42 : vector<1x8xf32> to vector<1x1x8xf32>
      tpu.vector_store %arg9[%c0_43, %c0_44, %c0_45], %45 {strides = array<i32>} : memref<1x1x8xf32, #tpu.memory_space<vmem>>, vector<1x1x8xf32>,
    } else {
    }
    return
  }
  func.func @transform_0(%arg0: i32, %arg1: i32) -> (i32, i32, i32) {
    %c0_i32 = arith.constant 0 : i32
    %c0_i32_0 = arith.constant 0 : i32
    return %arg0, %c0_i32, %arg1 : i32, i32, i32
  }
  func.func @transform_1(%arg0: i32, %arg1: i32) -> (i32, i32, i32) {
    %c0_i32 = arith.constant 0 : i32
    %c0_i32_0 = arith.constant 0 : i32
    return %arg0, %c0_i32, %arg1 : i32, i32, i32
  }
  func.func @transform_2(%arg0: i32, %arg1: i32) -> (i32, i32) {
    %c0_i32 = arith.constant 0 : i32
    %c0_i32_0 = arith.constant 0 : i32
    %c0_i32_1 = arith.constant 0 : i32
    return %c0_i32, %c0_i32_0 : i32, i32
  }
  func.func @transform_3(%arg0: i32, %arg1: i32) -> (i32, i32) {
    %c0_i32 = arith.constant 0 : i32
    %c0_i32_0 = arith.constant 0 : i32
    %c0_i32_1 = arith.constant 0 : i32
    return %c0_i32, %c0_i32_0 : i32, i32
  }
  func.func @transform_4(%arg0: i32, %arg1: i32) -> (i32, i32) {
    %c0_i32 = arith.constant 0 : i32
    %c0_i32_0 = arith.constant 0 : i32
    %c0_i32_1 = arith.constant 0 : i32
    return %c0_i32, %c0_i32_0 : i32, i32
  }
  func.func @transform_5(%arg0: i32, %arg1: i32) -> (i32, i32) {
    %c0_i32 = arith.constant 0 : i32
    %c0_i32_0 = arith.constant 0 : i32
    %c0_i32_1 = arith.constant 0 : i32
    return %c0_i32, %c0_i32_0 : i32, i32
  }
  func.func @transform_6(%arg0: i32, %arg1: i32) -> (i32, i32) {
    %c0_i32 = arith.constant 0 : i32
    %c0_i32_0 = arith.constant 0 : i32
    %c0_i32_1 = arith.constant 0 : i32
    return %c0_i32, %c0_i32_0 : i32, i32
  }
  func.func @transform_7(%arg0: i32, %arg1: i32) -> (i32, i32, i32) {
    %c0_i32 = arith.constant 0 : i32
    %c0_i32_0 = arith.constant 0 : i32
    %c0_i32_1 = arith.constant 0 : i32
    return %arg0, %c0_i32, %c0_i32_0 : i32, i32, i32
  }
}

</mosaic_0001>

<bundles_post_ra>
// kernel: tpu_custom_call.1
= control target key start
LH: loop header
LB: loop body
LE: loop exit
PB: predicated region body
PF: predicated region fallthrough
CT: control target
= control target key end

     0   :  { %12 = vsyncpa [#allocation5], 0  ;;  %s1202_s0 = inlined_call_operand.vmem [shape: f32[2,32,8], index: 0, kind: input, shape index: {}]   ;;  %s1203_s1 = inlined_call_operand.vmem [shape: f32[2,32,8], index: 1, kind: input, shape index: {}]   ;;  %s1204_s2 = inlined_call_operand.vmem [shape: f32[64,16], index: 2, kind: input, shape index: {}]   ;;  %s1205_s3 = inlined_call_operand.vmem [shape: f32[16,8], index: 3, kind: input, shape index: {}]   ;;  %s1206_s4 = inlined_call_operand.vmem [shape: f32[8,4], index: 4, kind: input, shape index: {}]   ;;  %s1207_s5 = inlined_call_operand.vmem [shape: f32[4,8], index: 5, kind: input, shape index: {}]   ;;  %s1208_s6 = inlined_call_operand.vmem [shape: f32[4,16], index: 6, kind: input, shape index: {}]   ;;  %s1209_s7 = inlined_call_operand.hbm [shape: f32[2,1,8], index: 7, kind: output, shape index: {}]  }
   0x1   :  { %14 = vsyncpa [#allocation5 + $0x1], 0  ;;  %s1033_s24 = smov 0   ;;  %s1035_s25 = smov 0  }
   0x2   :  { %s1037_s26 = smov 0   ;;  %s1039_s27 = smov 0  }
   0x3   :  { %s1041_s28 = smov 0   ;;  %s1043_s29 = smov 0  }
   0x4 LB: > { %s832_s30 = sadd.s32 4294967295, %s989_s29   ;;  %s833_s8 = sadd.s32 4294967294, %s989_s29   ;;  %s989_s29 = sphi %s1043_s29, %s20_s29   ;;  %s985_s28 = sphi %s1041_s28, %s1216_s28   ;;  %s981_s27 = sphi %s1039_s27, %s1215_s27   ;;  %s977_s26 = sphi %s1037_s26, %s1214_s26   ;;  %s973_s25 = sphi %s1035_s25, %s1213_s25   ;;  %s969_s24 = sphi %s1033_s24, %s1212_s24  }
   0x5   : > { %s32_s9 = sadd.s32 1, %s985_s28  ;;  %s200_s10 = sadd.s32 1, %s977_s26 }
   0x6   : > { %p34_p0 = scmp.ge.s32.totalorder %s32_s9, 2  ;;  %p210_p1 = scmp.ne.s32.totalorder %s977_s26, %s973_s25 }
   0x7   : > { %p211_p2 = scmp.eq.s32.totalorder %s832_s30, 1  ;;  %p216_p3 = scmp.ne.s32.totalorder %s973_s25, %s969_s24 }
   0x8   : > { %s1218_s9 = smov (%p34_p0, %s32_s9), 0  ;;  %p217_p5 = scmp.eq.s32.totalorder %s833_s8, 1 }
   0x9   : > { %p1073_p4 = por %p211_p2, %p210_p1  ;;  %s197_s12 = ssub.s32 %s985_s28, %s1218_s9 }
   0xa   : > { %p836_p6 = scmp.ge.s32.totalorder %s989_s29, 1  ;;  %p198_p7 = scmp.eq.s32.totalorder %s197_s12, 0 }
   0xb   : > { %p1080_p8 = por %p217_p5, %p216_p3  ;;  %p272_p9 = scmp.lt.s32.totalorder %s989_s29, 3 }
   0xc   : > { %s1086_s14 = scalar_select %p198_p7, %s977_s26, %s200_s10  }
   0xd   : > { %p273_p10 = pnand %p836_p6, %p272_p9 }
   0xe   : > { %p314_p11 = scmp.lt.s32.totalorder (!%p273_p10), %s981_s27, 1  ;;  %s312_s12 = sand.u32 (!%p273_p10), 1, %s973_s25  }
   0xf   : > { %276 = sbr.rel (%p273_p10) target bundleno = 933 (0x3a5), region = 48  ;;  %s741_s17 = scalar_lea.hbm (!%p273_p10), %s1209_s7, %s981_s27 }
  0x10   : > { %s313_s20 = scalar_lea.vmem (!%p273_p10), [#allocation4], %s312_s12  ;;  %s733_s23 = scalar_lea.sflag (!%p273_p10), [#allocation5], %s312_s12 }
  0x11   : > { %s743_s21 = sshll.u32 (!%p273_p10), %s313_s20, 4  ;;  %s744_s21 = int_to_ptr.vmem [resolvable:$true] %s743_s21 }
  0x14   : > { %s315_s15 = scalar_select %p314_p11, %s981_s27, 1  ;;  %vm346_vm0 = vcmask 64512   ;;  %v991_v16 = vmov 0   ;;  %vm334_vm1 = vcmask 253952   ;;  %vm455_vm2 = vcmask 130112  }
  0x15   : > { %908 = vset.pattern.permute.xlu2 %v991_v16  ;;  %909 = vset.pattern.permute.xlu0 %v991_v16  ;;  %vm459_vm3 = vcmask 195712   ;;  %vm463_vm4 = vcmask 261312   ;;  %vm596_vm5 = vcmask 261120   ;;  %vm649_vm6 = vcmask 130048  }
  0x16   : > { %s849_s16 = sshll.u32 %s315_s15, 5  ;;  %910 = vset.pattern.permute.xlu1 %v991_v16  ;;  %vm706_vm7 = vcmask 1043456   ;;  %vm702_vm8 = vcmask 31744   ;;  %vm730_vm9 = vcmask 57344   ;;  %s931_s15 = scalar_lea.hbm %s1209_s7, 2 }
  0x17   : > { %s321_s19 = scalar_lea.vmem %s1202_s0, %s849_s16  ;;  %s329_s22 = scalar_lea.vmem %s1203_s1, %s849_s16 }
  0x18   : > { %v337_v0 = vld [vmem:[%s321_s19] sm:$0xff]  ;;  %v339_v1 = vld [vmem:[%s321_s19 + $0x10] sm:$0xff]  ;;  %v338_v6 = vld [vmem:[%s321_s19 + $0x8] sm:$0xff] }
  0x19   : > { %v347_v2 = vsel %vm346_vm0, %v337_v0, -inf  ;;  %v353_v3 = vsel %vm346_vm0, %v339_v1, -inf  ;;  %v341_v4 = vld [vmem:[%s329_s22] sm:$0xff]  ;;  %v340_v7 = vld [vmem:[%s321_s19 + $0x18] sm:$0xff]  ;;  %v342_v8 = vld [vmem:[%s329_s22 + $0x8] sm:$0xff]  ;;  %v350_v9 = vsel %vm346_vm0, %v338_v6, -inf }
  0x1a   : > { %348 = vmax.xlane.f32.xlu0 %v347_v2  ;;  %354 = vmax.xlane.f32.xlu1 %v353_v3  ;;  %v470_v5 = vsel %vm346_vm0, %v341_v4, -inf  ;;  %v356_v10 = vsel %vm346_vm0, %v340_v7, -inf  ;;  %v473_v11 = vsel %vm346_vm0, %v342_v8, -inf  ;;  %v343_v12 = vld [vmem:[%s329_s22 + $0x10] sm:$0xff]  ;;  %v344_v13 = vld [vmem:[%s329_s22 + $0x18] sm:$0xff]  ;;  %s745_s22 = sshll.u32 %s741_s17, 4  ;;  %s746_s22 = int_to_ptr.hbm [resolvable:$true] %s745_s22 }
  0x1b   : > { %471 = vmax.xlane.f32.xlu2 %v470_v5  ;;  %v476_v14 = vsel %vm346_vm0, %v343_v12, -inf  ;;  %v479_v15 = vsel %vm346_vm0, %v344_v13, -inf  ;;  %s925_s30 = sshra.s32 %s746_s22, 4  ;;  %s926_s30 = int_to_ptr.hbm [resolvable:$true] %s925_s30 }
  0x1c   : > { %s927_s8 = scalar_lea.hbm %s926_s30, 1  ;;  %p932_p1 = scmp.lt.s32.totalorder %s926_s30, %s1209_s7 }
  0x1d   : > { %p928_p12 = scmp.ne.s32.totalorder %s926_s30, %s927_s8  ;;  %p933_p2 = scmp.lt.s32.totalorder %s931_s15, %s927_s8 }
  0x1f   : > { %p929_p13 = pnand %p928_p12, %p1073_p4  ;;  %p934_p3 = por %p933_p2, %p932_p1 }
  0x21   : > { %p930_p0 = pneg %p929_p13 }
  0x22   : > { %351 = vmax.xlane.f32.xlu0 %v350_v9  ;;  %357 = vmax.xlane.f32.xlu1 %v356_v10 }
  0x23   : > { %474 = vmax.xlane.f32.xlu2 %v473_v11  ;;  %p935_p5 = pnand %p934_p3, %p930_p0 }
  0x2a   : > { %477 = vmax.xlane.f32.xlu0 %v476_v14  ;;  %480 = vmax.xlane.f32.xlu1 %v479_v15 }
  0x8d   : > { %v349_v17 = vpop.xlane.xlu0 %348  ;;  %v355_v36 = vpop.xlane.xlu1 %354 }
  0x8e   : > { %v363_v18 = vperm.slane %v349_v17, 0  ;;  %v364_v19 = vperm.slane %v349_v17, 1  ;;  %v365_v20 = vperm.slane %v349_v17, 2  ;;  %v366_v21 = vperm.slane %v349_v17, 3  ;;  %v472_v56 = vpop.xlane.xlu2 %471 }
  0x8f   : > { %v367_v22 = vperm.slane %v349_v17, 4  ;;  %v368_v23 = vperm.slane %v349_v17, 5  ;;  %v369_v24 = vperm.slane %v349_v17, 6  ;;  %v370_v25 = vperm.slane %v349_v17, 7 }
  0x90   : > { %395 = vst [vmem:[#allocation1] ss:$9 sm:$0xff] %v363_v18  ;;  %v379_v37 = vperm.slane %v355_v36, 0  ;;  %v380_v38 = vperm.slane %v355_v36, 1  ;;  %v381_v39 = vperm.slane %v355_v36, 2  ;;  %v382_v41 = vperm.slane %v355_v36, 3 }
  0x91   : > { %397 = vst [vmem:[#allocation1 + $0x1] ss:$9 sm:$0xff] %v364_v19  ;;  %v383_v42 = vperm.slane %v355_v36, 4  ;;  %v384_v43 = vperm.slane %v355_v36, 5  ;;  %v385_v44 = vperm.slane %v355_v36, 6  ;;  %v386_v45 = vperm.slane %v355_v36, 7 }
  0x92   : > { %399 = vst [vmem:[#allocation1 + $0x2] ss:$9 sm:$0xff] %v365_v20  ;;  %v486_v57 = vperm.slane %v472_v56, 0  ;;  %v487_v58 = vperm.slane %v472_v56, 1  ;;  %v488_v59 = vperm.slane %v472_v56, 2  ;;  %v489_v61 = vperm.slane %v472_v56, 3 }
  0x93   : > { %401 = vst [vmem:[#allocation1 + $0x3] ss:$9 sm:$0xff] %v366_v21  ;;  %v490_v62 = vperm.slane %v472_v56, 4  ;;  %v491_v63 = vperm.slane %v472_v56, 5  ;;  %v492_v0 = vperm.slane %v472_v56, 6  ;;  %v493_v1 = vperm.slane %v472_v56, 7 }
  0x94   : > { %403 = vst [vmem:[#allocation1 + $0x4] ss:$9 sm:$0xff] %v367_v22 }
  0x95   : > { %405 = vst [vmem:[#allocation1 + $0x5] ss:$9 sm:$0xff] %v368_v23  ;;  %v352_v26 = vpop.xlane.xlu0 %351  ;;  %v358_v46 = vpop.xlane.xlu1 %357 }
  0x96   : > { %407 = vst [vmem:[#allocation1 + $0x6] ss:$9 sm:$0xff] %v369_v24  ;;  %v371_v27 = vperm.slane %v352_v26, 0  ;;  %v372_v28 = vperm.slane %v352_v26, 1  ;;  %v373_v29 = vperm.slane %v352_v26, 2  ;;  %v374_v31 = vperm.slane %v352_v26, 3  ;;  %v475_v2 = vpop.xlane.xlu2 %474 }
  0x97   : > { %409 = vst [vmem:[#allocation1 + $0x7] ss:$9 sm:$0xff] %v370_v25  ;;  %v375_v32 = vperm.slane %v352_v26, 4  ;;  %v376_v33 = vperm.slane %v352_v26, 5  ;;  %v377_v34 = vperm.slane %v352_v26, 6  ;;  %v378_v35 = vperm.slane %v352_v26, 7 }
  0x98   : > { %v387_v47 = vperm.slane %v358_v46, 0  ;;  %v388_v48 = vperm.slane %v358_v46, 1  ;;  %v389_v49 = vperm.slane %v358_v46, 2  ;;  %v390_v51 = vperm.slane %v358_v46, 3 }
  0x99   : > { %v391_v52 = vperm.slane %v358_v46, 4  ;;  %v392_v53 = vperm.slane %v358_v46, 5  ;;  %v393_v54 = vperm.slane %v358_v46, 6  ;;  %v394_v55 = vperm.slane %v358_v46, 7 }
  0x9a   : > { %v494_v3 = vperm.slane %v475_v2, 0  ;;  %v495_v4 = vperm.slane %v475_v2, 1  ;;  %v496_v5 = vperm.slane %v475_v2, 2  ;;  %v497_v7 = vperm.slane %v475_v2, 3 }
  0x9b   : > { %v498_v8 = vperm.slane %v475_v2, 4  ;;  %v499_v9 = vperm.slane %v475_v2, 5  ;;  %v500_v10 = vperm.slane %v475_v2, 6  ;;  %v501_v11 = vperm.slane %v475_v2, 7 }
  0x9d   : > { %v478_v12 = vpop.xlane.xlu0 %477  ;;  %v481_v22 = vpop.xlane.xlu1 %480 }
  0x9e   : > { %v410_v30 = vld [vmem:[#allocation1] sm:$0xff]  ;;  %v502_v13 = vperm.slane %v478_v12, 0  ;;  %v503_v14 = vperm.slane %v478_v12, 1  ;;  %v504_v15 = vperm.slane %v478_v12, 2  ;;  %v505_v16 = vperm.slane %v478_v12, 3 }
  0x9f   : > { %411 = vst [vmem:[#allocation1] ss:$9 sm:$0xff] %v371_v27  ;;  %439 = vperm.xlu2 %908, %v410_v30   ;;  %v506_v18 = vperm.slane %v478_v12, 4  ;;  %v507_v19 = vperm.slane %v478_v12, 5  ;;  %v508_v20 = vperm.slane %v478_v12, 6  ;;  %v509_v21 = vperm.slane %v478_v12, 7 }
  0xa0   : > { %412 = vst [vmem:[#allocation1 + $0x1] ss:$9 sm:$0xff] %v372_v28  ;;  %v510_v23 = vperm.slane %v481_v22, 0  ;;  %v511_v24 = vperm.slane %v481_v22, 1  ;;  %v512_v25 = vperm.slane %v481_v22, 2  ;;  %v513_v26 = vperm.slane %v481_v22, 3 }
  0xa1   : > { %413 = vst [vmem:[#allocation1 + $0x2] ss:$9 sm:$0xff] %v373_v29  ;;  %v514_v28 = vperm.slane %v481_v22, 4  ;;  %v515_v29 = vperm.slane %v481_v22, 5  ;;  %v516_v30 = vperm.slane %v481_v22, 6  ;;  %v646_v12 = vld [vmem:[%s1205_s3] sm:$0xff] }
  0xa2   : > { %414 = vst [vmem:[#allocation1 + $0x3] ss:$9 sm:$0xff] %v374_v31  ;;  %v517_v31 = vperm.slane %v481_v22, 7 }
  0xa3   : > { %415 = vst [vmem:[#allocation1 + $0x4] ss:$9 sm:$0xff] %v375_v32 }
  0xa4   : > { %416 = vst [vmem:[#allocation1 + $0x5] ss:$9 sm:$0xff] %v376_v33  ;;  %v992_v33 = vmov -inf  }
  0xa5   : > { %417 = vst [vmem:[#allocation1 + $0x6] ss:$9 sm:$0xff] %v377_v34  ;;  %v591_v34 = vld [vmem:[%s1204_s2 + $0x18] sm:$0xff] }
  0xa6   : > { %418 = vst [vmem:[#allocation1 + $0x7] ss:$9 sm:$0xff] %v378_v35  ;;  %v590_v35 = vld [vmem:[%s1204_s2 + $0x10] sm:$0xff]  ;;  %635 = vmatpush.msra.mxu1 %v591_v34 }
  0xa7   : > { %335 = vst.msk [vmem:[#allocation2] sm:$0x1] %vm334_vm1, %v992_v33 }
  0xa8   : > { %336 = vst.msk [vmem:[#allocation3] sm:$0x1] %vm334_vm1, %v992_v33  ;;  %636 = vmatpush.msra.mxu1 %v590_v35 }
  0xad   : > { %v419_v40 = vld [vmem:[#allocation1] sm:$0xff] }
  0xae   : > { %420 = vst [vmem:[#allocation1] ss:$9 sm:$0xff] %v379_v37  ;;  %442 = vperm.xlu0 %909, %v419_v40   ;;  %v589_v37 = vld [vmem:[%s1204_s2 + $0x8] sm:$0xff]  ;;  %v450_v40 = vlaneseq }
  0xaf   : > { %421 = vst [vmem:[#allocation1 + $0x1] ss:$9 sm:$0xff] %v380_v38  ;;  %v588_v38 = vld [vmem:[%s1204_s2] sm:$0xff]  ;;  %637 = vmatpush.msra.mxu1 %v589_v37 }
  0xb0   : > { %422 = vst [vmem:[#allocation1 + $0x2] ss:$9 sm:$0xff] %v381_v39 }
  0xb1   : > { %423 = vst [vmem:[#allocation1 + $0x3] ss:$9 sm:$0xff] %v382_v41  ;;  %638 = vmatpush.msra.mxu1 %v588_v38  ;;  %v451_v41 = vand.u32 127, %v450_v40 }
  0xb2   : > { %424 = vst [vmem:[#allocation1 + $0x4] ss:$9 sm:$0xff] %v383_v42 }
  0xb3   : > { %425 = vst [vmem:[#allocation1 + $0x5] ss:$9 sm:$0xff] %v384_v43  ;;  %v453_v42 = vadd.s32 4294967288, %v451_v41  ;;  %v457_v46 = vadd.s32 4294967280, %v451_v41 }
  0xb4   : > { %426 = vst [vmem:[#allocation1 + $0x6] ss:$9 sm:$0xff] %v385_v44 }
  0xb5   : > { %427 = vst [vmem:[#allocation1 + $0x7] ss:$9 sm:$0xff] %v386_v45 }
  0xbc   : > { %v428_v50 = vld [vmem:[#allocation1] sm:$0xff] }
  0xbd   : > { %429 = vst [vmem:[#allocation1] ss:$9 sm:$0xff] %v387_v47  ;;  %445 = vperm.xlu2 %908, %v428_v50  }
  0xbe   : > { %430 = vst [vmem:[#allocation1 + $0x1] ss:$9 sm:$0xff] %v388_v48  ;;  %v461_v48 = vadd.s32 4294967272, %v451_v41 }
  0xbf   : > { %431 = vst [vmem:[#allocation1 + $0x2] ss:$9 sm:$0xff] %v389_v49 }
  0xc0   : > { %432 = vst [vmem:[#allocation1 + $0x3] ss:$9 sm:$0xff] %v390_v51 }
  0xc1   : > { %433 = vst [vmem:[#allocation1 + $0x4] ss:$9 sm:$0xff] %v391_v52  ;;  %v345_v52 = vld [vmem:[#allocation2] sm:$0x1] }
  0xc2   : > { %434 = vst [vmem:[#allocation1 + $0x5] ss:$9 sm:$0xff] %v392_v53 }
  0xc3   : > { %435 = vst [vmem:[#allocation1 + $0x6] ss:$9 sm:$0xff] %v393_v54 }
  0xc4   : > { %436 = vst [vmem:[#allocation1 + $0x7] ss:$9 sm:$0xff] %v394_v55 }
  0xcb   : > { %v437_v60 = vld [vmem:[#allocation1] sm:$0xff] }
  0xcc   : > { %518 = vst [vmem:[#allocation1] ss:$9 sm:$0xff] %v486_v57 }
  0xcd   : > { %520 = vst [vmem:[#allocation1 + $0x1] ss:$9 sm:$0xff] %v487_v58  ;;  %v595_v58 = vld [vmem:[%s1204_s2 + $0x38] sm:$0xff] }
  0xce   : > { %522 = vst [vmem:[#allocation1 + $0x2] ss:$9 sm:$0xff] %v488_v59  ;;  %v594_v59 = vld [vmem:[%s1204_s2 + $0x30] sm:$0xff]  ;;  %612 = vmatpush.msra.mxu0 %v595_v58 }
  0xcf   : > { %524 = vst [vmem:[#allocation1 + $0x3] ss:$9 sm:$0xff] %v489_v61  ;;  %v592_v61 = vld [vmem:[%s1204_s2 + $0x20] sm:$0xff] }
  0xd0   : > { %526 = vst [vmem:[#allocation1 + $0x4] ss:$9 sm:$0xff] %v490_v62  ;;  %613 = vmatpush.msra.mxu0 %v594_v59 }
  0xd1   : > { %528 = vst [vmem:[#allocation1 + $0x5] ss:$9 sm:$0xff] %v491_v63 }
  0xd2   : > { %530 = vst [vmem:[#allocation1 + $0x6] ss:$9 sm:$0xff] %v492_v0 }
  0xd3   : > { %532 = vst [vmem:[#allocation1 + $0x7] ss:$9 sm:$0xff] %v493_v1 }
  0xda   : > { %v533_v6 = vld [vmem:[#allocation1] sm:$0xff] }
  0xdb   : > { %534 = vst [vmem:[#allocation1] ss:$9 sm:$0xff] %v494_v3  ;;  %562 = vperm.xlu1 %910, %v533_v6  }
  0xdc   : > { %535 = vst [vmem:[#allocation1 + $0x1] ss:$9 sm:$0xff] %v495_v4 }
  0xdd   : > { %536 = vst [vmem:[#allocation1 + $0x2] ss:$9 sm:$0xff] %v496_v5  ;;  %v469_v5 = vld [vmem:[#allocation3] sm:$0x1] }
  0xde   : > { %537 = vst [vmem:[#allocation1 + $0x3] ss:$9 sm:$0xff] %v497_v7 }
  0xdf   : > { %538 = vst [vmem:[#allocation1 + $0x4] ss:$9 sm:$0xff] %v498_v8 }
  0xe0   : > { %539 = vst [vmem:[#allocation1 + $0x5] ss:$9 sm:$0xff] %v499_v9 }
  0xe1   : > { %540 = vst [vmem:[#allocation1 + $0x6] ss:$9 sm:$0xff] %v500_v10 }
  0xe2   : > { %541 = vst [vmem:[#allocation1 + $0x7] ss:$9 sm:$0xff] %v501_v11  ;;  %v647_v11 = vld [vmem:[%s1205_s3 + $0x8] sm:$0xff] }
  0xe3   : > { %667 = vmatpush.msra.mxu2 %v647_v11 }
  0xe5   : > { %668 = vmatpush.msra.mxu2 %v646_v12 }
  0xe9   : > { %v542_v17 = vld [vmem:[#allocation1] sm:$0xff] }
  0xea   : > { %565 = vperm.xlu2 %908, %v542_v17   ;;  %543 = vst [vmem:[#allocation1] ss:$9 sm:$0xff] %v502_v13 }
  0xeb   : > { %544 = vst [vmem:[#allocation1 + $0x1] ss:$9 sm:$0xff] %v503_v14 }
  0xec   : > { %545 = vst [vmem:[#allocation1 + $0x2] ss:$9 sm:$0xff] %v504_v15  ;;  %v643_v15 = vld [vmem:[%s1208_s6] sm:$0x1] }
  0xed   : > { %546 = vst [vmem:[#allocation1 + $0x3] ss:$9 sm:$0xff] %v505_v16 }
  0xee   : > { %547 = vst [vmem:[#allocation1 + $0x4] ss:$9 sm:$0xff] %v506_v18 }
  0xef   : > { %548 = vst [vmem:[#allocation1 + $0x5] ss:$9 sm:$0xff] %v507_v19  ;;  %v674_v19 = vld [vmem:[%s1206_s4] sm:$0xff] }
  0xf0   : > { %549 = vst [vmem:[#allocation1 + $0x6] ss:$9 sm:$0xff] %v508_v20  ;;  %694 = vmatpush.msra.mxu3 %v674_v19  ;;  %v700_v20 = vld [vmem:[%s1207_s5] sm:$0xf] }
  0xf1   : > { %550 = vst [vmem:[#allocation1 + $0x7] ss:$9 sm:$0xff] %v509_v21  ;;  %v648_v21 = vld [vmem:[%s1208_s6 + $0x1] sm:$0x1] }
  0xf2   : > { %448 = vperm.xlu2 %908, %v437_v60   ;;  %v593_v60 = vld [vmem:[%s1204_s2 + $0x28] sm:$0xff]  ;;  %845 = vmatpush.msk.msrb.mxu3 %vm706_vm7, %v700_v20 }
  0xf3   : > { %614 = vmatpush.msra.mxu0 %v593_v60 }
  0xf5   : > { %615 = vmatpush.msra.mxu0 %v592_v61 }
  0xf8   : > { %v551_v27 = vld [vmem:[#allocation1] sm:$0xff] }
  0xf9   : > { %568 = vperm.xlu1 %910, %v551_v27   ;;  %552 = vst [vmem:[#allocation1] ss:$9 sm:$0xff] %v510_v23  ;;  %v440_v36 = vpop.permute.xlu2 %439 }
  0xfa   : > { %553 = vst [vmem:[#allocation1 + $0x1] ss:$9 sm:$0xff] %v511_v24  ;;  %v452_v47 = vperm.slane %v440_v36, %v451_v41 }
  0xfb   : > { %554 = vst [vmem:[#allocation1 + $0x2] ss:$9 sm:$0xff] %v512_v25  ;;  %v675_v25 = vld [vmem:[%s1208_s6 + $0x2] sm:$0x1] }
  0xfc   : > { %555 = vst [vmem:[#allocation1 + $0x3] ss:$9 sm:$0xff] %v513_v26 }
  0xfd   : > { %556 = vst [vmem:[#allocation1 + $0x4] ss:$9 sm:$0xff] %v514_v28 }
  0xfe   : > { %557 = vst [vmem:[#allocation1 + $0x5] ss:$9 sm:$0xff] %v515_v29  ;;  %v701_v29 = vld [vmem:[%s1208_s6 + $0x3] sm:$0x1] }
  0xff   : > { %558 = vst [vmem:[#allocation1 + $0x6] ss:$9 sm:$0xff] %v516_v30 }
 0x100   : > { %559 = vst [vmem:[#allocation1 + $0x7] ss:$9 sm:$0xff] %v517_v31 }
 0x107   : > { %v560_v32 = vld [vmem:[#allocation1] sm:$0xff] }
 0x108   : > { %571 = vperm.xlu1 %910, %v560_v32  }
 0x117   : > { %v446_v39 = vpop.permute.xlu2 %445 }
 0x118   : > { %v458_v50 = vperm.slane %v446_v39, %v457_v46 }
 0x120   : > { %v443_v43 = vpop.permute.xlu0 %442 }
 0x121   : > { %v454_v45 = vperm.slane %v443_v43, %v453_v42 }
 0x123   : > { %v456_v49 = vsel %vm455_vm2, %v454_v45, %v452_v47 }
 0x124   : > { %v460_v54 = vsel %vm459_vm3, %v458_v50, %v456_v49 }
 0x144   : > { %v566_v44 = vpop.permute.xlu2 %565 }
 0x145   : > { %v574_v2 = vperm.slane %v566_v44, %v453_v42 }
 0x14c   : > { %v449_v51 = vpop.permute.xlu2 %448 }
 0x14d   : > { %v462_v53 = vperm.slane %v449_v51, %v461_v48  ;;  %v563_v62 = vpop.permute.xlu1 %562 }
 0x14e   : > { %v573_v0 = vperm.slane %v563_v62, %v451_v41 }
 0x14f   : > { %v464_v55 = vsel %vm463_vm4, %v462_v53, %v460_v54 }
 0x150   : > { %v466_v56 = vmax.f32 %v345_v52, %v464_v55  ;;  %v575_v4 = vsel %vm455_vm2, %v574_v2, %v573_v0 }
 0x152   : > { %468 = vst.msk [vmem:[#allocation2] sm:$0x1] %vm334_vm1, %v466_v56 }
 0x159   : > { %v586_v57 = vld [vmem:[#allocation2] sm:$0x1] }
 0x15a   : > { %842 = vmatmul.msk.f32.vlgmr.msra.gmra.mxu1 %vm596_vm5, %v586_v57 }
 0x16b   : > { %v569_v63 = vpop.permute.xlu1 %568 }
 0x16c   : > { %v576_v1 = vperm.slane %v569_v63, %v457_v46 }
 0x16e   : > { %v577_v7 = vsel %vm459_vm3, %v576_v1, %v575_v4 }
 0x17a   : > { %v572_v3 = vpop.permute.xlu1 %571 }
 0x17b   : > { %v578_v6 = vperm.slane %v572_v3, %v461_v48 }
 0x17d   : > { %v579_v8 = vsel %vm463_vm4, %v578_v6, %v577_v7 }
 0x17e   : > { %v581_v9 = vmax.f32 %v469_v5, %v579_v8 }
 0x180   : > { %582 = vst.msk [vmem:[#allocation3] sm:$0x1] %vm334_vm1, %v581_v9 }
 0x187   : > { %v587_v10 = vld [vmem:[#allocation3] sm:$0x1] }
 0x188   : > { %841 = vmatmul.msk.f32.vlgmr.msra.gmra.mxu0 %vm596_vm5, %v587_v10 }
 0x1d7   : > { %v640_v13 = vpop.f32.mrf.mxu1 }
 0x205   : > { %v617_v14 = vpop.f32.mrf.mxu0 }
 0x206   : > { %v641_v16 = vadd.f32 %v640_v13, %v617_v14 }
 0x208   : > { %v644_v17 = vadd.f32 %v643_v15, %v641_v16 }
 0x20a   : > { %v645_v18 = vmax.f32 %v644_v17, 0.0 }
 0x20c   : > { %843 = vmatmul.msk.f32.vlgmr.msra.gmra.mxu2 %vm649_vm6, %v645_v18 }
 0x28f   : > { %v670_v22 = vpop.f32.mrf.mxu2 }
 0x290   : > { %v671_v23 = vadd.f32 %v670_v22, %v648_v21 }
 0x292   : > { %v673_v24 = vmax.f32 %v671_v23, 0.0 }
 0x294   : > { %844 = vmatmul.msk.f32.vlgmr.msra.gmra.mxu3 %vm346_vm0, %v673_v24 }
 0x317   : > { %v696_v26 = vpop.f32.mrf.mxu3 }
 0x318   : > { %v697_v27 = vadd.f32 %v696_v26, %v675_v25 }
 0x31a   : > { %v699_v28 = vmax.f32 %v697_v27, 0.0 }
 0x31c   : > { %846 = vmatmul.msk.f32.vlgmr.msrb.gmra.mxu3 %vm702_vm8, %v699_v28 }
 0x39f   : > { %v727_v30 = vpop.f32.mrf.mxu3 }
 0x3a0   : > { %v728_v31 = vadd.f32 %v727_v30, %v701_v29 }
 0x3a2   : > { %731 = vst.msk [vmem:[%s313_s20] sm:$0x1] %vm730_vm9, %v728_v31 }
 0x3a3   : > { %938 = shalt.err (!%p935_p5)
}
 0x3a4   : > { %851 = dma.vmem_to_hbm [thread:$0]  (%p1073_p4), %s744_s21, 16, %s746_s22, %s733_s23  }
 0x3a5 PF: > { %p857_p6 = scmp.ge.s32.totalorder %s989_s29, 2  ;;  %s757_s12 = sand.u32 1, %s969_s24  }
 0x3a6   : > { %s758_s18 = scalar_lea.sflag [#allocation5], %s757_s12 }
 0x3a7   : > { %p854_p7 = pnand %p857_p6, %p1080_p8 }
 0x3a9   : > { %p855_p9 = pneg %p854_p7 }
 0x3ab   : > { %964 = dma.done.wait (%p855_p9), %s758_s18, 16  }
 0x3ac   : > { %966 = vsyncadd (%p855_p9), %s758_s18, 4294967280  ;;  %s20_s29 = sadd.s32 1, %s989_s29   ;;  %s1212_s24 = smov %s973_s25 }
 0x3ad   : > { %p17_p10 = scmp.ge.s32.totalorder %s20_s29, 4   ;;  %s1213_s25 = smov %s977_s26 }
 0x3ae   : > { %s1214_s26 = smov %s1086_s14  ;;  %s1215_s27 = smov %s985_s28 }
 0x3af   : > { %s1216_s28 = smov %s1218_s9  ;;  %19 = sbr.rel (!%p17_p10) target bundleno = 4 (0x4), region = 108 }
 0x3b4   :  { %763 = vsyncpa [#allocation5], 1 }
 0x3b5   :  { %765 = vsyncpa [#allocation5 + $0x1], 1 }

</bundles_post_ra>
